<compile_context>
chip_gen: v5e
topology: v5e:2x2
jax: 0.10.0
libtpu: 0.0.40
codegen_flags: <defaults>
</compile_context>

<pallas_src>
import functools
import math

import jax
import jax.numpy as jnp
from jax.experimental import pallas as pl
from jax.experimental.pallas import tpu as pltpu


# ----------------------------------------------------------------------------
# Pallas kernel: full encoder stack; grid = (batch_tile, layer).
# ----------------------------------------------------------------------------
def _encoder_stack_kernel(
    x_ref,                       # (N, C) f32, N = B_tile*T (read at layer 0)
    wqkv_ref, bqkv_ref,          # (1, C, 2*Hk+Hv) bf16, (1, 1, 2*Hk+Hv) f32
    wo_ref, bo_ref,              # (1, Hv, C) bf16,      (1, 1, C) f32
    g1_ref, be1_ref,             # (1, 1, C) f32         -- LayerNorm 1
    w1_ref, b1_ref,              # (1, C, F) bf16, (1, 1, F) f32
    w2_ref, b2_ref,              # (1, F, C) bf16, (1, 1, C) f32
    g2_ref, be2_ref,             # (1, 1, C) f32         -- LayerNorm 2
    o_ref,                       # (N, C) f32  -- resident activation carrier
    *, batch, seq_len, num_heads, qk_length, value_length,
):
    B, T, H = batch, seq_len, num_heads
    dk, dv = qk_length, value_length
    Hk, Hv = H * dk, H * dv
    N = B * T

    # Layer 0 of this batch tile: seed the resident activation from the input.
    @pl.when(pl.program_id(1) == 0)
    def _():
        o_ref[...] = x_ref[...]

    x = o_ref[...]                                   # (N, C) f32
    xb = x.astype(jnp.bfloat16)

    # --- fused QKV projection: one MXU contraction over C --------------------
    # Note: 1/sqrt(dk) already folded into wq/bq at parameter-prep time.
    qkv = jnp.dot(xb, wqkv_ref[0],
                  preferred_element_type=jnp.float32) + bqkv_ref[0]   # (N, 2Hk+Hv)
    q = qkv[:, :Hk].reshape(B, T, Hk).astype(jnp.bfloat16)            # (B, T, Hk)
    k = qkv[:, Hk:2 * Hk].reshape(B, T, Hk).astype(jnp.bfloat16)      # (B, T, Hk)
    v = qkv[:, 2 * Hk:].reshape(B, T, Hv).astype(jnp.bfloat16)        # (B, T, Hv)

    # --- multi-head attention -------------------------------------------------
    # Per-head score/softmax/PV; head outputs are concatenated so the output
    # projection below is a single K=Hv matmul (instead of H K=dv matmuls).
    heads = []
    for h in range(H):
        qh = q[:, :, h * dk:(h + 1) * dk]                             # (B, T, dk)
        kh = k[:, :, h * dk:(h + 1) * dk]                             # (B, T, dk)
        vh = v[:, :, h * dv:(h + 1) * dv]                             # (B, T, dv)
        s = jnp.einsum("btd,bsd->bts", qh, kh,
                       preferred_element_type=jnp.float32)            # (B, T, T)
        m = jnp.max(s, axis=-1, keepdims=True)
        p = jnp.exp(s - m)
        p = p * pl.reciprocal(jnp.sum(p, axis=-1, keepdims=True), approx=True)
        heads.append(jnp.einsum("bts,bsd->btd", p.astype(jnp.bfloat16), vh,
                                preferred_element_type=jnp.float32))  # (B, T, dv)
    o_heads = jnp.concatenate(heads, axis=-1).reshape(N, Hv)          # (N, Hv)

    # Single output projection for all heads.
    attn = jnp.dot(o_heads.astype(jnp.bfloat16), wo_ref[0],
                   preferred_element_type=jnp.float32) + bo_ref[0]    # (N, C)

    # --- LayerNorm (matches nn.LayerNorm: biased var, eps=1e-5) --------------
    # Single reduction pass: var = E[z^2] - mean^2 (halves XLU reductions).
    def layernorm(z, gamma, beta):
        mu = jnp.mean(z, axis=-1, keepdims=True)
        ex2 = jnp.mean(z * z, axis=-1, keepdims=True)
        var = jnp.maximum(ex2 - mu * mu, 0.0)
        return (z - mu) * jax.lax.rsqrt(var + 1e-5) * gamma + beta

    # out2 = x + norm1(attention(x, x, x))
    out2 = x + layernorm(attn, g1_ref[0], be1_ref[0])

    # --- FFN: Linear -> ReLU -> Linear ---------------------------------------
    h1 = jnp.dot(out2.astype(jnp.bfloat16), w1_ref[0],
                 preferred_element_type=jnp.float32) + b1_ref[0]
    h1 = jnp.maximum(h1, 0.0)
    ffn = jnp.dot(h1.astype(jnp.bfloat16), w2_ref[0],
                  preferred_element_type=jnp.float32) + b2_ref[0]

    # out4 = out2 + norm2(ffn(out2))   (dropout == identity in eval mode)
    o_ref[...] = out2 + layernorm(ffn, g2_ref[0], be2_ref[0])


def _vmem_limit_bytes():
    """Explicit scoped-VMEM budget, clamped safely below physical capacity."""
    try:
        cap = int(pltpu.get_tpu_info().vmem_capacity_bytes)
        return min((cap * 3) // 4, 96 * 1024 * 1024)
    except Exception:
        return 48 * 1024 * 1024   # safe on v5e/v6e/v7x


def encoder_pallas(tokens, emb, stacked, pe, *, num_layers, num_heads,
                   qk_length, value_length, batch_tiles=1):
    """tokens: (B, T) int32 -> (B, T, C) float32 through the full stack."""
    # Embedding lookup + positional encoding: plain-JAX glue.
    x = jnp.take(emb, tokens, axis=0)
    B, T = tokens.shape
    C = emb.shape[1]
    x = x + pe[:T][None, :, :]

    assert B % batch_tiles == 0
    Bt = B // batch_tiles          # batch elements per tile
    Nt = Bt * T                    # rows per tile
    N = B * T
    Hk = num_heads * qk_length
    Hv = num_heads * value_length
    Hqkv = 2 * Hk + Hv
    F = stacked["w1"].shape[-1]

    kernel = functools.partial(
        _encoder_stack_kernel, batch=Bt, seq_len=T, num_heads=num_heads,
        qk_length=qk_length, value_length=value_length)

    def wspec(*shape):
        nd = len(shape)
        return pl.BlockSpec((1,) + tuple(shape),
                            lambda b, l, _nd=nd: (l,) + (0,) * _nd)

    grid_spec = pltpu.PrefetchScalarGridSpec(
        num_scalar_prefetch=0,
        grid=(batch_tiles, num_layers),
        in_specs=[
            pl.BlockSpec((Nt, C), lambda b, l: (b, 0)),        # x (layer 0 only)
            wspec(C, Hqkv), wspec(1, Hqkv),                    # wqkv, bqkv
            wspec(Hv, C), wspec(1, C),                         # wo, bo
            wspec(1, C), wspec(1, C),                          # gamma1, beta1
            wspec(C, F), wspec(1, F),                          # w1, b1
            wspec(F, C), wspec(1, C),                          # w2, b2
            wspec(1, C), wspec(1, C),                          # gamma2, beta2
        ],
        out_specs=pl.BlockSpec((Nt, C), lambda b, l: (b, 0)),  # resident carrier
    )

    out = pl.pallas_call(
        kernel,
        out_shape=jax.ShapeDtypeStruct((N, C), jnp.float32),
        grid_spec=grid_spec,
        input_output_aliases={0: 0},       # activation carrier reuses x's HBM
        compiler_params=pltpu.CompilerParams(
            dimension_semantics=("parallel", "arbitrary"),
            vmem_limit_bytes=_vmem_limit_bytes()),
    )(
        x.reshape(N, C).astype(jnp.float32),
        stacked["wqkv"], stacked["bqkv"],
        stacked["wo"], stacked["bo"],
        stacked["g1"], stacked["be1"],
        stacked["w1"], stacked["b1"],
        stacked["w2"], stacked["b2"],
        stacked["g2"], stacked["be2"],
    )
    return out.reshape(B, T, C)


# ----------------------------------------------------------------------------
# Parameter init (PyTorch-like, f32) + kernel-side parameter preparation.
# ----------------------------------------------------------------------------
def make_positional_encoding(d_model, max_len):
    position = jnp.arange(max_len, dtype=jnp.float32)[:, None]          # (L, 1)
    div_term = jnp.exp(jnp.arange(0, d_model, 2, dtype=jnp.float32)
                       * (-math.log(10000.0) / d_model))                # (d/2,)
    pe = jnp.zeros((max_len, d_model), dtype=jnp.float32)
    pe = pe.at[:, 0::2].set(jnp.sin(position * div_term))
    pe = pe.at[:, 1::2].set(jnp.cos(position * div_term))
    return pe                                                           # (L, C)


def init_linear(key, fan_in, fan_out):
    """PyTorch nn.Linear-style init; weight stored as (in, out)."""
    kw, kb = jax.random.split(key)
    bound = 1.0 / math.sqrt(fan_in)
    w = jax.random.uniform(kw, (fan_in, fan_out), jnp.float32, -bound, bound)
    b = jax.random.uniform(kb, (1, fan_out), jnp.float32, -bound, bound)
    return w, b


def init_encoder_params(key, *, vocab_size, num_layers, num_heads,
                        embedding_dim, ffn_hidden_dim, qk_length, value_length):
    C = embedding_dim
    Hk = num_heads * qk_length
    Hv = num_heads * value_length
    F = ffn_hidden_dim

    key, ek = jax.random.split(key)
    emb = jax.random.normal(ek, (vocab_size, C), jnp.float32)   # nn.Embedding init

    layers = []
    for _ in range(num_layers):
        key, k1, k2, k3, k4, k5, k6 = jax.random.split(key, 7)
        wq, bq = init_linear(k1, C, Hk)
        wk, bk = init_linear(k2, C, Hk)
        wv, bv = init_linear(k3, C, Hv)
        wo, bo = init_linear(k4, Hv, C)
        w1, b1 = init_linear(k5, C, F)
        w2, b2 = init_linear(k6, F, C)
        layers.append(dict(
            wq=wq, bq=bq, wk=wk, bk=bk, wv=wv, bv=bv, wo=wo, bo=bo,
            g1=jnp.ones((1, C), jnp.float32), be1=jnp.zeros((1, C), jnp.float32),
            w1=w1, b1=b1, w2=w2, b2=b2,
            g2=jnp.ones((1, C), jnp.float32), be2=jnp.zeros((1, C), jnp.float32),
        ))
    return emb, layers


def stack_layer_params(layers, *, qk_length):
    """Stack per-layer params along a leading layer axis for the fused kernel.

    - Concatenates [wq*scale | wk | wv] into one QKV matrix (scale folded in).
    - Casts matmul weights to bf16; biases / LayerNorm params stay f32.
    """
    scale = 1.0 / math.sqrt(qk_length)

    def stk(fn, dtype=None):
        a = jnp.stack([fn(p) for p in layers], axis=0)
        return a.astype(dtype) if dtype is not None else a

    return dict(
        wqkv=stk(lambda p: jnp.concatenate(
            [p["wq"] * scale, p["wk"], p["wv"]], axis=1), jnp.bfloat16),
        bqkv=stk(lambda p: jnp.concatenate(
            [p["bq"] * scale, p["bk"], p["bv"]], axis=1)),
        wo=stk(lambda p: p["wo"], jnp.bfloat16),
        bo=stk(lambda p: p["bo"]),
        g1=stk(lambda p: p["g1"]), be1=stk(lambda p: p["be1"]),
        w1=stk(lambda p: p["w1"], jnp.bfloat16), b1=stk(lambda p: p["b1"]),
        w2=stk(lambda p: p["w2"], jnp.bfloat16), b2=stk(lambda p: p["b2"]),
        g2=stk(lambda p: p["g2"]), be2=stk(lambda p: p["be2"]),
    )


# ----------------------------------------------------------------------------
# Pure-JAX f32 reference (for a correctness self-check).
# ----------------------------------------------------------------------------
def _layernorm_ref(z, g, b):
    mu = jnp.mean(z, axis=-1, keepdims=True)
    var = jnp.mean((z - mu) ** 2, axis=-1, keepdims=True)
    return (z - mu) / jnp.sqrt(var + 1e-5) * g + b


def encoder_layer_ref(x, p, *, num_heads, qk_length, value_length):
    B, T, C = x.shape
    dk, dv = qk_length, value_length
    q = x @ p["wq"] + p["bq"][0]
    k = x @ p["wk"] + p["bk"][0]
    v = x @ p["wv"] + p["bv"][0]
    q = q.reshape(B, T, num_heads, dk).transpose(0, 2, 1, 3)
    k = k.reshape(B, T, num_heads, dk).transpose(0, 2, 1, 3)
    v = v.reshape(B, T, num_heads, dv).transpose(0, 2, 1, 3)
    s = jnp.einsum("bhtd,bhsd->bhts", q, k) / math.sqrt(dk)
    a = jax.nn.softmax(s, axis=-1)
    o = jnp.einsum("bhts,bhsd->bhtd", a, v).transpose(0, 2, 1, 3).reshape(B, T, -1)
    attn = o @ p["wo"] + p["bo"][0]
    out2 = x + _layernorm_ref(attn, p["g1"][0], p["be1"][0])
    ffn = jnp.maximum(out2 @ p["w1"] + p["b1"][0], 0.0) @ p["w2"] + p["b2"][0]
    return out2 + _layernorm_ref(ffn, p["g2"][0], p["be2"][0])


# ----------------------------------------------------------------------------
if __name__ == "__main__":
    # Small config consistent with the module's constructor.
    vocab_size = 50
    num_layers = 2
    num_heads = 4
    embedding_dim = 32
    ffn_hidden_dim = 64
    qk_length = 8
    value_length = 8
    max_length = 64
    B, T = 2, 8
    batch_tiles = 2          # leading "parallel" grid axis (megacore-ready)

    key = jax.random.PRNGKey(0)
    key, pk, tk = jax.random.split(key, 3)

    emb, layers = init_encoder_params(
        pk, vocab_size=vocab_size, num_layers=num_layers, num_heads=num_heads,
        embedding_dim=embedding_dim, ffn_hidden_dim=ffn_hidden_dim,
        qk_length=qk_length, value_length=value_length)
    pe = make_positional_encoding(embedding_dim, max_length)
    stacked = stack_layer_params(layers, qk_length=qk_length)

    tokens = jax.random.randint(tk, (B, T), 0, vocab_size, dtype=jnp.int32)

    run = jax.jit(functools.partial(
        encoder_pallas, num_layers=num_layers, num_heads=num_heads,
        qk_length=qk_length, value_length=value_length,
        batch_tiles=batch_tiles))
    out = jax.block_until_ready(run(tokens, emb, stacked, pe))

    # Self-check against a pure-f32 JAX reference (bf16 matmuls + approx
    # reciprocal in the kernel => loosened tolerance).
    x_ref = jnp.take(emb, tokens, axis=0) + pe[:T][None, :, :]
    for p in layers:
        x_ref = encoder_layer_ref(x_ref, p, num_heads=num_heads,
                                  qk_length=qk_length, value_length=value_length)
    err = float(jnp.max(jnp.abs(out - x_ref)))
    tol = 5e-2 + 2e-2 * float(jnp.max(jnp.abs(x_ref)))
    assert out.shape == (B, T, embedding_dim)
    assert err < tol, f"max abs error {err} (tol {tol})"

    print("KERNEL_OK")
</pallas_src>

<mosaic_0001>
module attributes {stable_mosaic.version = 11 : i64} {
  func.func @_encoder_stack_kernel(%arg0: i32, %arg1: i32, %arg2: memref<8x32xf32, #tpu.memory_space<vmem>>, %arg3: memref<1x32x96xbf16, #tpu.memory_space<vmem>>, %arg4: memref<1x1x96xf32, #tpu.memory_space<vmem>>, %arg5: memref<1x32x32xbf16, #tpu.memory_space<vmem>>, %arg6: memref<1x1x32xf32, #tpu.memory_space<vmem>>, %arg7: memref<1x1x32xf32, #tpu.memory_space<vmem>>, %arg8: memref<1x1x32xf32, #tpu.memory_space<vmem>>, %arg9: memref<1x32x64xbf16, #tpu.memory_space<vmem>>, %arg10: memref<1x1x64xf32, #tpu.memory_space<vmem>>, %arg11: memref<1x64x32xbf16, #tpu.memory_space<vmem>>, %arg12: memref<1x1x32xf32, #tpu.memory_space<vmem>>, %arg13: memref<1x1x32xf32, #tpu.memory_space<vmem>>, %arg14: memref<1x1x32xf32, #tpu.memory_space<vmem>>, %arg15: memref<8x32xf32, #tpu.memory_space<vmem>>) attributes {dimension_semantics = [#tpu.dimension_semantics<parallel>, #tpu.dimension_semantics<arbitrary>], iteration_bounds = array<i64: 2, 2>, scalar_prefetch = 0 : i64, scratch_operands = 0 : i64, tpu.core_type = #tpu.core_type<tc>, window_params = [{transform_indices = @transform_0, window_bounds = array<i64: 8, 32>}, {transform_indices = @transform_1, window_bounds = array<i64: 1, 32, 96>}, {transform_indices = @transform_2, window_bounds = array<i64: 1, 1, 96>}, {transform_indices = @transform_3, window_bounds = array<i64: 1, 32, 32>}, {transform_indices = @transform_4, window_bounds = array<i64: 1, 1, 32>}, {transform_indices = @transform_5, window_bounds = array<i64: 1, 1, 32>}, {transform_indices = @transform_6, window_bounds = array<i64: 1, 1, 32>}, {transform_indices = @transform_7, window_bounds = array<i64: 1, 32, 64>}, {transform_indices = @transform_8, window_bounds = array<i64: 1, 1, 64>}, {transform_indices = @transform_9, window_bounds = array<i64: 1, 64, 32>}, {transform_indices = @transform_10, window_bounds = array<i64: 1, 1, 32>}, {transform_indices = @transform_11, window_bounds = array<i64: 1, 1, 32>}, {transform_indices = @transform_12, window_bounds = array<i64: 1, 1, 32>}, {transform_indices = @transform_13, window_bounds = array<i64: 8, 32>}]} {
    %c0_i32 = arith.constant 0 : i32
    %0 = arith.cmpi eq, %arg1, %c0_i32 : i32
    %1 = arith.extui %0 : i1 to i32
    %c0_i32_0 = arith.constant 0 : i32
    %2 = arith.cmpi ne, %1, %c0_i32_0 : i32
    scf.if %2 {
      %c0_72 = arith.constant 0 : index
      %c0_73 = arith.constant 0 : index
      %172 = vector.load %arg2[%c0_72, %c0_73] : memref<8x32xf32, #tpu.memory_space<vmem>>, vector<8x32xf32>
      %c0_74 = arith.constant 0 : index
      %c0_75 = arith.constant 0 : index
      %173 = vector.load %arg15[%c0_74, %c0_75] : memref<8x32xf32, #tpu.memory_space<vmem>>, vector<8x32xf32>
      tpu.vector_store %arg15[%c0_74, %c0_75], %172 {strides = array<i32>} : memref<8x32xf32, #tpu.memory_space<vmem>>, vector<8x32xf32>,
    } else {
    }
    %c0 = arith.constant 0 : index
    %c0_1 = arith.constant 0 : index
    %3 = vector.load %arg15[%c0, %c0_1] : memref<8x32xf32, #tpu.memory_space<vmem>>, vector<8x32xf32>
    %4 = arith.truncf %3 : vector<8x32xf32> to vector<8x32xbf16>
    %c0_2 = arith.constant 0 : index
    %c0_3 = arith.constant 0 : index
    %c0_4 = arith.constant 0 : index
    %5 = vector.load %arg3[%c0_2, %c0_3, %c0_4] : memref<1x32x96xbf16, #tpu.memory_space<vmem>>, vector<1x32x96xbf16>
    %6 = vector.shape_cast %5 : vector<1x32x96xbf16> to vector<32x96xbf16>
    %cst = arith.constant dense<0.000000e+00> : vector<8x96xf32>
    %7 = tpu.matmul %4, %6, %cst {dimension_numbers = #tpu.dot_dimension_numbers<[1], [0], [0], [1], [0, 0, 1, 1], [], []>} : vector<8x32xbf16>, vector<32x96xbf16>, vector<8x96xf32> -> vector<8x96xf32>
    %c0_5 = arith.constant 0 : index
    %c0_6 = arith.constant 0 : index
    %c0_7 = arith.constant 0 : index
    %8 = vector.load %arg4[%c0_5, %c0_6, %c0_7] : memref<1x1x96xf32, #tpu.memory_space<vmem>>, vector<1x1x96xf32>
    %9 = vector.shape_cast %8 : vector<1x1x96xf32> to vector<1x96xf32>
    %10 = vector.broadcast %9 : vector<1x96xf32> to vector<8x96xf32>
    %11 = arith.addf %7, %10 : vector<8x96xf32>
    %12 = vector.extract_strided_slice %11 {offsets = [0, 0], sizes = [8, 32], strides = [1, 1]} : vector<8x96xf32> to vector<8x32xf32>
    %13 = vector.shape_cast %12 : vector<8x32xf32> to vector<1x8x32xf32>
    %14 = arith.truncf %13 : vector<1x8x32xf32> to vector<1x8x32xbf16>
    %15 = vector.extract_strided_slice %11 {offsets = [0, 32], sizes = [8, 32], strides = [1, 1]} : vector<8x96xf32> to vector<8x32xf32>
    %16 = vector.shape_cast %15 : vector<8x32xf32> to vector<1x8x32xf32>
    %17 = arith.truncf %16 : vector<1x8x32xf32> to vector<1x8x32xbf16>
    %18 = vector.extract_strided_slice %11 {offsets = [0, 64], sizes = [8, 32], strides = [1, 1]} : vector<8x96xf32> to vector<8x32xf32>
    %19 = vector.shape_cast %18 : vector<8x32xf32> to vector<1x8x32xf32>
    %20 = arith.truncf %19 : vector<1x8x32xf32> to vector<1x8x32xbf16>
    %21 = vector.extract_strided_slice %14 {offsets = [0, 0, 0], sizes = [1, 8, 8], strides = [1, 1, 1]} : vector<1x8x32xbf16> to vector<1x8x8xbf16>
    %22 = vector.extract_strided_slice %17 {offsets = [0, 0, 0], sizes = [1, 8, 8], strides = [1, 1, 1]} : vector<1x8x32xbf16> to vector<1x8x8xbf16>
    %23 = vector.extract_strided_slice %20 {offsets = [0, 0, 0], sizes = [1, 8, 8], strides = [1, 1, 1]} : vector<1x8x32xbf16> to vector<1x8x8xbf16>
    "tpu.trace_start"() <{level = 10 : i32, message = "btd,bsd->bts"}> : () -> ()
    %cst_8 = arith.constant dense<0.000000e+00> : vector<1x8x8xf32>
    %24 = tpu.matmul %21, %22, %cst_8 {dimension_numbers = #tpu.dot_dimension_numbers<[2], [2], [1], [1], [0, 0, 0, 1, 1, 1], [0], [0]>} : vector<1x8x8xbf16>, vector<1x8x8xbf16>, vector<1x8x8xf32> -> vector<1x8x8xf32>
    "tpu.trace_stop"() : () -> ()
    %cst_9 = arith.constant dense<0xFF800000> : vector<1x8xf32>
    %25 = vector.multi_reduction <maximumf>, %24, %cst_9 [2] : vector<1x8x8xf32> to vector<1x8xf32>
    %26 = vector.shape_cast %25 : vector<1x8xf32> to vector<1x8x1xf32>
    %27 = vector.broadcast %26 : vector<1x8x1xf32> to vector<1x8x8xf32>
    %28 = arith.subf %24, %27 : vector<1x8x8xf32>
    %29 = math.exp %28 : vector<1x8x8xf32>
    %cst_10 = arith.constant dense<0.000000e+00> : vector<1x8xf32>
    %30 = vector.multi_reduction <add>, %29, %cst_10 [2] : vector<1x8x8xf32> to vector<1x8xf32>
    %31 = vector.shape_cast %30 : vector<1x8xf32> to vector<1x8x1xf32>
    %32 = tpu.reciprocal %31 {approx = true} : vector<1x8x1xf32> -> vector<1x8x1xf32>
    %33 = vector.broadcast %32 : vector<1x8x1xf32> to vector<1x8x8xf32>
    %34 = arith.mulf %29, %33 : vector<1x8x8xf32>
    %35 = arith.truncf %34 : vector<1x8x8xf32> to vector<1x8x8xbf16>
    "tpu.trace_start"() <{level = 10 : i32, message = "bts,bsd->btd"}> : () -> ()
    %cst_11 = arith.constant dense<0.000000e+00> : vector<1x8x8xf32>
    %36 = tpu.matmul %35, %23, %cst_11 {dimension_numbers = #tpu.dot_dimension_numbers<[2], [1], [1], [2], [0, 0, 0, 1, 1, 2], [0], [0]>} : vector<1x8x8xbf16>, vector<1x8x8xbf16>, vector<1x8x8xf32> -> vector<1x8x8xf32>
    "tpu.trace_stop"() : () -> ()
    %37 = vector.extract_strided_slice %14 {offsets = [0, 0, 8], sizes = [1, 8, 8], strides = [1, 1, 1]} : vector<1x8x32xbf16> to vector<1x8x8xbf16>
    %38 = vector.extract_strided_slice %17 {offsets = [0, 0, 8], sizes = [1, 8, 8], strides = [1, 1, 1]} : vector<1x8x32xbf16> to vector<1x8x8xbf16>
    %39 = vector.extract_strided_slice %20 {offsets = [0, 0, 8], sizes = [1, 8, 8], strides = [1, 1, 1]} : vector<1x8x32xbf16> to vector<1x8x8xbf16>
    "tpu.trace_start"() <{level = 10 : i32, message = "btd,bsd->bts"}> : () -> ()
    %cst_12 = arith.constant dense<0.000000e+00> : vector<1x8x8xf32>
    %40 = tpu.matmul %37, %38, %cst_12 {dimension_numbers = #tpu.dot_dimension_numbers<[2], [2], [1], [1], [0, 0, 0, 1, 1, 1], [0], [0]>} : vector<1x8x8xbf16>, vector<1x8x8xbf16>, vector<1x8x8xf32> -> vector<1x8x8xf32>
    "tpu.trace_stop"() : () -> ()
    %cst_13 = arith.constant dense<0xFF800000> : vector<1x8xf32>
    %41 = vector.multi_reduction <maximumf>, %40, %cst_13 [2] : vector<1x8x8xf32> to vector<1x8xf32>
    %42 = vector.shape_cast %41 : vector<1x8xf32> to vector<1x8x1xf32>
    %43 = vector.broadcast %42 : vector<1x8x1xf32> to vector<1x8x8xf32>
    %44 = arith.subf %40, %43 : vector<1x8x8xf32>
    %45 = math.exp %44 : vector<1x8x8xf32>
    %cst_14 = arith.constant dense<0.000000e+00> : vector<1x8xf32>
    %46 = vector.multi_reduction <add>, %45, %cst_14 [2] : vector<1x8x8xf32> to vector<1x8xf32>
    %47 = vector.shape_cast %46 : vector<1x8xf32> to vector<1x8x1xf32>
    %48 = tpu.reciprocal %47 {approx = true} : vector<1x8x1xf32> -> vector<1x8x1xf32>
    %49 = vector.broadcast %48 : vector<1x8x1xf32> to vector<1x8x8xf32>
    %50 = arith.mulf %45, %49 : vector<1x8x8xf32>
    %51 = arith.truncf %50 : vector<1x8x8xf32> to vector<1x8x8xbf16>
    "tpu.trace_start"() <{level = 10 : i32, message = "bts,bsd->btd"}> : () -> ()
    %cst_15 = arith.constant dense<0.000000e+00> : vector<1x8x8xf32>
    %52 = tpu.matmul %51, %39, %cst_15 {dimension_numbers = #tpu.dot_dimension_numbers<[2], [1], [1], [2], [0, 0, 0, 1, 1, 2], [0], [0]>} : vector<1x8x8xbf16>, vector<1x8x8xbf16>, vector<1x8x8xf32> -> vector<1x8x8xf32>
    "tpu.trace_stop"() : () -> ()
    %53 = vector.extract_strided_slice %14 {offsets = [0, 0, 16], sizes = [1, 8, 8], strides = [1, 1, 1]} : vector<1x8x32xbf16> to vector<1x8x8xbf16>
    %54 = vector.extract_strided_slice %17 {offsets = [0, 0, 16], sizes = [1, 8, 8], strides = [1, 1, 1]} : vector<1x8x32xbf16> to vector<1x8x8xbf16>
    %55 = vector.extract_strided_slice %20 {offsets = [0, 0, 16], sizes = [1, 8, 8], strides = [1, 1, 1]} : vector<1x8x32xbf16> to vector<1x8x8xbf16>
    "tpu.trace_start"() <{level = 10 : i32, message = "btd,bsd->bts"}> : () -> ()
    %cst_16 = arith.constant dense<0.000000e+00> : vector<1x8x8xf32>
    %56 = tpu.matmul %53, %54, %cst_16 {dimension_numbers = #tpu.dot_dimension_numbers<[2], [2], [1], [1], [0, 0, 0, 1, 1, 1], [0], [0]>} : vector<1x8x8xbf16>, vector<1x8x8xbf16>, vector<1x8x8xf32> -> vector<1x8x8xf32>
    "tpu.trace_stop"() : () -> ()
    %cst_17 = arith.constant dense<0xFF800000> : vector<1x8xf32>
    %57 = vector.multi_reduction <maximumf>, %56, %cst_17 [2] : vector<1x8x8xf32> to vector<1x8xf32>
    %58 = vector.shape_cast %57 : vector<1x8xf32> to vector<1x8x1xf32>
    %59 = vector.broadcast %58 : vector<1x8x1xf32> to vector<1x8x8xf32>
    %60 = arith.subf %56, %59 : vector<1x8x8xf32>
    %61 = math.exp %60 : vector<1x8x8xf32>
    %cst_18 = arith.constant dense<0.000000e+00> : vector<1x8xf32>
    %62 = vector.multi_reduction <add>, %61, %cst_18 [2] : vector<1x8x8xf32> to vector<1x8xf32>
    %63 = vector.shape_cast %62 : vector<1x8xf32> to vector<1x8x1xf32>
    %64 = tpu.reciprocal %63 {approx = true} : vector<1x8x1xf32> -> vector<1x8x1xf32>
    %65 = vector.broadcast %64 : vector<1x8x1xf32> to vector<1x8x8xf32>
    %66 = arith.mulf %61, %65 : vector<1x8x8xf32>
    %67 = arith.truncf %66 : vector<1x8x8xf32> to vector<1x8x8xbf16>
    "tpu.trace_start"() <{level = 10 : i32, message = "bts,bsd->btd"}> : () -> ()
    %cst_19 = arith.constant dense<0.000000e+00> : vector<1x8x8xf32>
    %68 = tpu.matmul %67, %55, %cst_19 {dimension_numbers = #tpu.dot_dimension_numbers<[2], [1], [1], [2], [0, 0, 0, 1, 1, 2], [0], [0]>} : vector<1x8x8xbf16>, vector<1x8x8xbf16>, vector<1x8x8xf32> -> vector<1x8x8xf32>
    "tpu.trace_stop"() : () -> ()
    %69 = vector.extract_strided_slice %14 {offsets = [0, 0, 24], sizes = [1, 8, 8], strides = [1, 1, 1]} : vector<1x8x32xbf16> to vector<1x8x8xbf16>
    %70 = vector.extract_strided_slice %17 {offsets = [0, 0, 24], sizes = [1, 8, 8], strides = [1, 1, 1]} : vector<1x8x32xbf16> to vector<1x8x8xbf16>
    %71 = vector.extract_strided_slice %20 {offsets = [0, 0, 24], sizes = [1, 8, 8], strides = [1, 1, 1]} : vector<1x8x32xbf16> to vector<1x8x8xbf16>
    "tpu.trace_start"() <{level = 10 : i32, message = "btd,bsd->bts"}> : () -> ()
    %cst_20 = arith.constant dense<0.000000e+00> : vector<1x8x8xf32>
    %72 = tpu.matmul %69, %70, %cst_20 {dimension_numbers = #tpu.dot_dimension_numbers<[2], [2], [1], [1], [0, 0, 0, 1, 1, 1], [0], [0]>} : vector<1x8x8xbf16>, vector<1x8x8xbf16>, vector<1x8x8xf32> -> vector<1x8x8xf32>
    "tpu.trace_stop"() : () -> ()
    %cst_21 = arith.constant dense<0xFF800000> : vector<1x8xf32>
    %73 = vector.multi_reduction <maximumf>, %72, %cst_21 [2] : vector<1x8x8xf32> to vector<1x8xf32>
    %74 = vector.shape_cast %73 : vector<1x8xf32> to vector<1x8x1xf32>
    %75 = vector.broadcast %74 : vector<1x8x1xf32> to vector<1x8x8xf32>
    %76 = arith.subf %72, %75 : vector<1x8x8xf32>
    %77 = math.exp %76 : vector<1x8x8xf32>
    %cst_22 = arith.constant dense<0.000000e+00> : vector<1x8xf32>
    %78 = vector.multi_reduction <add>, %77, %cst_22 [2] : vector<1x8x8xf32> to vector<1x8xf32>
    %79 = vector.shape_cast %78 : vector<1x8xf32> to vector<1x8x1xf32>
    %80 = tpu.reciprocal %79 {approx = true} : vector<1x8x1xf32> -> vector<1x8x1xf32>
    %81 = vector.broadcast %80 : vector<1x8x1xf32> to vector<1x8x8xf32>
    %82 = arith.mulf %77, %81 : vector<1x8x8xf32>
    %83 = arith.truncf %82 : vector<1x8x8xf32> to vector<1x8x8xbf16>
    "tpu.trace_start"() <{level = 10 : i32, message = "bts,bsd->btd"}> : () -> ()
    %cst_23 = arith.constant dense<0.000000e+00> : vector<1x8x8xf32>
    %84 = tpu.matmul %83, %71, %cst_23 {dimension_numbers = #tpu.dot_dimension_numbers<[2], [1], [1], [2], [0, 0, 0, 1, 1, 2], [0], [0]>} : vector<1x8x8xbf16>, vector<1x8x8xbf16>, vector<1x8x8xf32> -> vector<1x8x8xf32>
    "tpu.trace_stop"() : () -> ()
    %85 = tpu.concatenate %36, %52, %68, %84 in 2 : vector<1x8x8xf32>, vector<1x8x8xf32>, vector<1x8x8xf32>, vector<1x8x8xf32> -> vector<1x8x32xf32>
    %86 = vector.shape_cast %85 : vector<1x8x32xf32> to vector<8x32xf32>
    %87 = arith.truncf %86 : vector<8x32xf32> to vector<8x32xbf16>
    %c0_24 = arith.constant 0 : index
    %c0_25 = arith.constant 0 : index
    %c0_26 = arith.constant 0 : index
    %88 = vector.load %arg5[%c0_24, %c0_25, %c0_26] : memref<1x32x32xbf16, #tpu.memory_space<vmem>>, vector<1x32x32xbf16>
    %89 = vector.shape_cast %88 : vector<1x32x32xbf16> to vector<32x32xbf16>
    %cst_27 = arith.constant dense<0.000000e+00> : vector<8x32xf32>
    %90 = tpu.matmul %87, %89, %cst_27 {dimension_numbers = #tpu.dot_dimension_numbers<[1], [0], [0], [1], [0, 0, 1, 1], [], []>} : vector<8x32xbf16>, vector<32x32xbf16>, vector<8x32xf32> -> vector<8x32xf32>
    %c0_28 = arith.constant 0 : index
    %c0_29 = arith.constant 0 : index
    %c0_30 = arith.constant 0 : index
    %91 = vector.load %arg6[%c0_28, %c0_29, %c0_30] : memref<1x1x32xf32, #tpu.memory_space<vmem>>, vector<1x1x32xf32>
    %92 = vector.shape_cast %91 : vector<1x1x32xf32> to vector<1x32xf32>
    %93 = vector.broadcast %92 : vector<1x32xf32> to vector<8x32xf32>
    %94 = arith.addf %90, %93 : vector<8x32xf32>
    %c0_31 = arith.constant 0 : index
    %c0_32 = arith.constant 0 : index
    %c0_33 = arith.constant 0 : index
    %95 = vector.load %arg7[%c0_31, %c0_32, %c0_33] : memref<1x1x32xf32, #tpu.memory_space<vmem>>, vector<1x1x32xf32>
    %96 = vector.shape_cast %95 : vector<1x1x32xf32> to vector<1x32xf32>
    %c0_34 = arith.constant 0 : index
    %c0_35 = arith.constant 0 : index
    %c0_36 = arith.constant 0 : index
    %97 = vector.load %arg8[%c0_34, %c0_35, %c0_36] : memref<1x1x32xf32, #tpu.memory_space<vmem>>, vector<1x1x32xf32>
    %98 = vector.shape_cast %97 : vector<1x1x32xf32> to vector<1x32xf32>
    %cst_37 = arith.constant dense<0.000000e+00> : vector<8xf32>
    %99 = vector.multi_reduction <add>, %94, %cst_37 [1] : vector<8x32xf32> to vector<8xf32>
    %100 = vector.shape_cast %99 : vector<8xf32> to vector<8x1xf32>
    %cst_38 = arith.constant 3.200000e+01 : f32
    %101 = vector.broadcast %cst_38 : f32 to vector<8x1xf32>
    %102 = arith.divf %100, %101 : vector<8x1xf32>
    %103 = arith.mulf %94, %94 : vector<8x32xf32>
    %cst_39 = arith.constant dense<0.000000e+00> : vector<8xf32>
    %104 = vector.multi_reduction <add>, %103, %cst_39 [1] : vector<8x32xf32> to vector<8xf32>
    %105 = vector.shape_cast %104 : vector<8xf32> to vector<8x1xf32>
    %cst_40 = arith.constant 3.200000e+01 : f32
    %106 = vector.broadcast %cst_40 : f32 to vector<8x1xf32>
    %107 = arith.divf %105, %106 : vector<8x1xf32>
    %108 = arith.mulf %102, %102 : vector<8x1xf32>
    %109 = arith.subf %107, %108 : vector<8x1xf32>
    %cst_41 = arith.constant 0.000000e+00 : f32
    %110 = vector.broadcast %cst_41 : f32 to vector<8x1xf32>
    %111 = arith.maximumf %109, %110 : vector<8x1xf32>
    %112 = vector.broadcast %102 : vector<8x1xf32> to vector<8x32xf32>
    %113 = arith.subf %94, %112 : vector<8x32xf32>
    %cst_42 = arith.constant 9.99999974E-6 : f32
    %114 = vector.broadcast %cst_42 : f32 to vector<8x1xf32>
    %115 = arith.addf %111, %114 : vector<8x1xf32>
    %116 = math.rsqrt %115 : vector<8x1xf32>
    %117 = vector.broadcast %116 : vector<8x1xf32> to vector<8x32xf32>
    %118 = arith.mulf %113, %117 : vector<8x32xf32>
    %119 = vector.broadcast %96 : vector<1x32xf32> to vector<8x32xf32>
    %120 = arith.mulf %118, %119 : vector<8x32xf32>
    %121 = vector.broadcast %98 : vector<1x32xf32> to vector<8x32xf32>
    %122 = arith.addf %120, %121 : vector<8x32xf32>
    %123 = arith.addf %3, %122 : vector<8x32xf32>
    %124 = arith.truncf %123 : vector<8x32xf32> to vector<8x32xbf16>
    %c0_43 = arith.constant 0 : index
    %c0_44 = arith.constant 0 : index
    %c0_45 = arith.constant 0 : index
    %125 = vector.load %arg9[%c0_43, %c0_44, %c0_45] : memref<1x32x64xbf16, #tpu.memory_space<vmem>>, vector<1x32x64xbf16>
    %126 = vector.shape_cast %125 : vector<1x32x64xbf16> to vector<32x64xbf16>
    %cst_46 = arith.constant dense<0.000000e+00> : vector<8x64xf32>
    %127 = tpu.matmul %124, %126, %cst_46 {dimension_numbers = #tpu.dot_dimension_numbers<[1], [0], [0], [1], [0, 0, 1, 1], [], []>} : vector<8x32xbf16>, vector<32x64xbf16>, vector<8x64xf32> -> vector<8x64xf32>
    %c0_47 = arith.constant 0 : index
    %c0_48 = arith.constant 0 : index
    %c0_49 = arith.constant 0 : index
    %128 = vector.load %arg10[%c0_47, %c0_48, %c0_49] : memref<1x1x64xf32, #tpu.memory_space<vmem>>, vector<1x1x64xf32>
    %129 = vector.shape_cast %128 : vector<1x1x64xf32> to vector<1x64xf32>
    %130 = vector.broadcast %129 : vector<1x64xf32> to vector<8x64xf32>
    %131 = arith.addf %127, %130 : vector<8x64xf32>
    %cst_50 = arith.constant 0.000000e+00 : f32
    %132 = vector.broadcast %cst_50 : f32 to vector<8x64xf32>
    %133 = arith.maximumf %131, %132 : vector<8x64xf32>
    %134 = arith.truncf %133 : vector<8x64xf32> to vector<8x64xbf16>
    %c0_51 = arith.constant 0 : index
    %c0_52 = arith.constant 0 : index
    %c0_53 = arith.constant 0 : index
    %135 = vector.load %arg11[%c0_51, %c0_52, %c0_53] : memref<1x64x32xbf16, #tpu.memory_space<vmem>>, vector<1x64x32xbf16>
    %136 = vector.shape_cast %135 : vector<1x64x32xbf16> to vector<64x32xbf16>
    %cst_54 = arith.constant dense<0.000000e+00> : vector<8x32xf32>
    %137 = tpu.matmul %134, %136, %cst_54 {dimension_numbers = #tpu.dot_dimension_numbers<[1], [0], [0], [1], [0, 0, 1, 1], [], []>} : vector<8x64xbf16>, vector<64x32xbf16>, vector<8x32xf32> -> vector<8x32xf32>
    %c0_55 = arith.constant 0 : index
    %c0_56 = arith.constant 0 : index
    %c0_57 = arith.constant 0 : index
    %138 = vector.load %arg12[%c0_55, %c0_56, %c0_57] : memref<1x1x32xf32, #tpu.memory_space<vmem>>, vector<1x1x32xf32>
    %139 = vector.shape_cast %138 : vector<1x1x32xf32> to vector<1x32xf32>
    %140 = vector.broadcast %139 : vector<1x32xf32> to vector<8x32xf32>
    %141 = arith.addf %137, %140 : vector<8x32xf32>
    %c0_58 = arith.constant 0 : index
    %c0_59 = arith.constant 0 : index
    %c0_60 = arith.constant 0 : index
    %142 = vector.load %arg13[%c0_58, %c0_59, %c0_60] : memref<1x1x32xf32, #tpu.memory_space<vmem>>, vector<1x1x32xf32>
    %143 = vector.shape_cast %142 : vector<1x1x32xf32> to vector<1x32xf32>
    %c0_61 = arith.constant 0 : index
    %c0_62 = arith.constant 0 : index
    %c0_63 = arith.constant 0 : index
    %144 = vector.load %arg14[%c0_61, %c0_62, %c0_63] : memref<1x1x32xf32, #tpu.memory_space<vmem>>, vector<1x1x32xf32>
    %145 = vector.shape_cast %144 : vector<1x1x32xf32> to vector<1x32xf32>
    %cst_64 = arith.constant dense<0.000000e+00> : vector<8xf32>
    %146 = vector.multi_reduction <add>, %141, %cst_64 [1] : vector<8x32xf32> to vector<8xf32>
    %147 = vector.shape_cast %146 : vector<8xf32> to vector<8x1xf32>
    %cst_65 = arith.constant 3.200000e+01 : f32
    %148 = vector.broadcast %cst_65 : f32 to vector<8x1xf32>
    %149 = arith.divf %147, %148 : vector<8x1xf32>
    %150 = arith.mulf %141, %141 : vector<8x32xf32>
    %cst_66 = arith.constant dense<0.000000e+00> : vector<8xf32>
    %151 = vector.multi_reduction <add>, %150, %cst_66 [1] : vector<8x32xf32> to vector<8xf32>
    %152 = vector.shape_cast %151 : vector<8xf32> to vector<8x1xf32>
    %cst_67 = arith.constant 3.200000e+01 : f32
    %153 = vector.broadcast %cst_67 : f32 to vector<8x1xf32>
    %154 = arith.divf %152, %153 : vector<8x1xf32>
    %155 = arith.mulf %149, %149 : vector<8x1xf32>
    %156 = arith.subf %154, %155 : vector<8x1xf32>
    %cst_68 = arith.constant 0.000000e+00 : f32
    %157 = vector.broadcast %cst_68 : f32 to vector<8x1xf32>
    %158 = arith.maximumf %156, %157 : vector<8x1xf32>
    %159 = vector.broadcast %149 : vector<8x1xf32> to vector<8x32xf32>
    %160 = arith.subf %141, %159 : vector<8x32xf32>
    %cst_69 = arith.constant 9.99999974E-6 : f32
    %161 = vector.broadcast %cst_69 : f32 to vector<8x1xf32>
    %162 = arith.addf %158, %161 : vector<8x1xf32>
    %163 = math.rsqrt %162 : vector<8x1xf32>
    %164 = vector.broadcast %163 : vector<8x1xf32> to vector<8x32xf32>
    %165 = arith.mulf %160, %164 : vector<8x32xf32>
    %166 = vector.broadcast %143 : vector<1x32xf32> to vector<8x32xf32>
    %167 = arith.mulf %165, %166 : vector<8x32xf32>
    %168 = vector.broadcast %145 : vector<1x32xf32> to vector<8x32xf32>
    %169 = arith.addf %167, %168 : vector<8x32xf32>
    %170 = arith.addf %123, %169 : vector<8x32xf32>
    %c0_70 = arith.constant 0 : index
    %c0_71 = arith.constant 0 : index
    %171 = vector.load %arg15[%c0_70, %c0_71] : memref<8x32xf32, #tpu.memory_space<vmem>>, vector<8x32xf32>
    tpu.vector_store %arg15[%c0_70, %c0_71], %170 {strides = array<i32>} : memref<8x32xf32, #tpu.memory_space<vmem>>, vector<8x32xf32>,
    return
  }
  func.func @transform_0(%arg0: i32, %arg1: i32) -> (i32, i32) {
    %c0_i32 = arith.constant 0 : i32
    %c0_i32_0 = arith.constant 0 : i32
    return %arg0, %c0_i32 : i32, i32
  }
  func.func @transform_1(%arg0: i32, %arg1: i32) -> (i32, i32, i32) {
    %c0_i32 = arith.constant 0 : i32
    %c0_i32_0 = arith.constant 0 : i32
    %c0_i32_1 = arith.constant 0 : i32
    return %arg1, %c0_i32, %c0_i32_0 : i32, i32, i32
  }
  func.func @transform_2(%arg0: i32, %arg1: i32) -> (i32, i32, i32) {
    %c0_i32 = arith.constant 0 : i32
    %c0_i32_0 = arith.constant 0 : i32
    %c0_i32_1 = arith.constant 0 : i32
    return %arg1, %c0_i32, %c0_i32_0 : i32, i32, i32
  }
  func.func @transform_3(%arg0: i32, %arg1: i32) -> (i32, i32, i32) {
    %c0_i32 = arith.constant 0 : i32
    %c0_i32_0 = arith.constant 0 : i32
    %c0_i32_1 = arith.constant 0 : i32
    return %arg1, %c0_i32, %c0_i32_0 : i32, i32, i32
  }
  func.func @transform_4(%arg0: i32, %arg1: i32) -> (i32, i32, i32) {
    %c0_i32 = arith.constant 0 : i32
    %c0_i32_0 = arith.constant 0 : i32
    %c0_i32_1 = arith.constant 0 : i32
    return %arg1, %c0_i32, %c0_i32_0 : i32, i32, i32
  }
  func.func @transform_5(%arg0: i32, %arg1: i32) -> (i32, i32, i32) {
    %c0_i32 = arith.constant 0 : i32
    %c0_i32_0 = arith.constant 0 : i32
    %c0_i32_1 = arith.constant 0 : i32
    return %arg1, %c0_i32, %c0_i32_0 : i32, i32, i32
  }
  func.func @transform_6(%arg0: i32, %arg1: i32) -> (i32, i32, i32) {
    %c0_i32 = arith.constant 0 : i32
    %c0_i32_0 = arith.constant 0 : i32
    %c0_i32_1 = arith.constant 0 : i32
    return %arg1, %c0_i32, %c0_i32_0 : i32, i32, i32
  }
  func.func @transform_7(%arg0: i32, %arg1: i32) -> (i32, i32, i32) {
    %c0_i32 = arith.constant 0 : i32
    %c0_i32_0 = arith.constant 0 : i32
    %c0_i32_1 = arith.constant 0 : i32
    return %arg1, %c0_i32, %c0_i32_0 : i32, i32, i32
  }
  func.func @transform_8(%arg0: i32, %arg1: i32) -> (i32, i32, i32) {
    %c0_i32 = arith.constant 0 : i32
    %c0_i32_0 = arith.constant 0 : i32
    %c0_i32_1 = arith.constant 0 : i32
    return %arg1, %c0_i32, %c0_i32_0 : i32, i32, i32
  }
  func.func @transform_9(%arg0: i32, %arg1: i32) -> (i32, i32, i32) {
    %c0_i32 = arith.constant 0 : i32
    %c0_i32_0 = arith.constant 0 : i32
    %c0_i32_1 = arith.constant 0 : i32
    return %arg1, %c0_i32, %c0_i32_0 : i32, i32, i32
  }
  func.func @transform_10(%arg0: i32, %arg1: i32) -> (i32, i32, i32) {
    %c0_i32 = arith.constant 0 : i32
    %c0_i32_0 = arith.constant 0 : i32
    %c0_i32_1 = arith.constant 0 : i32
    return %arg1, %c0_i32, %c0_i32_0 : i32, i32, i32
  }
  func.func @transform_11(%arg0: i32, %arg1: i32) -> (i32, i32, i32) {
    %c0_i32 = arith.constant 0 : i32
    %c0_i32_0 = arith.constant 0 : i32
    %c0_i32_1 = arith.constant 0 : i32
    return %arg1, %c0_i32, %c0_i32_0 : i32, i32, i32
  }
  func.func @transform_12(%arg0: i32, %arg1: i32) -> (i32, i32, i32) {
    %c0_i32 = arith.constant 0 : i32
    %c0_i32_0 = arith.constant 0 : i32
    %c0_i32_1 = arith.constant 0 : i32
    return %arg1, %c0_i32, %c0_i32_0 : i32, i32, i32
  }
  func.func @transform_13(%arg0: i32, %arg1: i32) -> (i32, i32) {
    %c0_i32 = arith.constant 0 : i32
    %c0_i32_0 = arith.constant 0 : i32
    return %arg0, %c0_i32 : i32, i32
  }
}

</mosaic_0001>

<bundles_post_ra>
// kernel: encoder_pallas.1
= control target key start
LH: loop header
LB: loop body
LE: loop exit
PB: predicated region body
PF: predicated region fallthrough
CT: control target
= control target key end

     0   :  { %s1619_s25 = smov 0   ;;  %s1621_s26 = smov 0   ;;  %s1828_s0 = inlined_call_operand.vmem [shape: f32[16,32], index: 0, kind: input, shape index: {}, may-alias: {0,13}]   ;;  %s1829_s1 = inlined_call_operand.vmem [shape: bf16[2,32,96], index: 1, kind: input, shape index: {}]   ;;  %s1830_s2 = inlined_call_operand.vmem [shape: f32[2,1,96], index: 2, kind: input, shape index: {}]   ;;  %s1831_s3 = inlined_call_operand.vmem [shape: bf16[2,32,32], index: 3, kind: input, shape index: {}]   ;;  %s1832_s4 = inlined_call_operand.vmem [shape: f32[2,1,32], index: 4, kind: input, shape index: {}]   ;;  %s1833_s5 = inlined_call_operand.vmem [shape: f32[2,1,32], index: 5, kind: input, shape index: {}]   ;;  %s1834_s6 = inlined_call_operand.vmem [shape: f32[2,1,32], index: 6, kind: input, shape index: {}]   ;;  %s1835_s7 = inlined_call_operand.vmem [shape: bf16[2,32,64], index: 7, kind: input, shape index: {}]   ;;  %s1836_s8 = inlined_call_operand.vmem [shape: f32[2,1,64], index: 8, kind: input, shape index: {}]   ;;  %s1837_s9 = inlined_call_operand.vmem [shape: bf16[2,64,32], index: 9, kind: input, shape index: {}]   ;;  %s1838_s10 = inlined_call_operand.vmem [shape: f32[2,1,32], index: 10, kind: input, shape index: {}]   ;;  %s1839_s11 = inlined_call_operand.vmem [shape: f32[2,1,32], index: 11, kind: input, shape index: {}]   ;;  %s1840_s12 = inlined_call_operand.vmem [shape: f32[2,1,32], index: 12, kind: input, shape index: {}]   ;;  %s1841_s13 = inlined_call_operand.vmem [shape: f32[16,32], index: 13, kind: output, shape index: {}, may-alias: {0,13}]  }
   0x1   :  { %1846 = sst [smem:[#allocation8_spill]] %s1828_s0  ;;  %s1623_s27 = smov 0  }
   0x2   :  { %1847 = sst [smem:[#allocation9_spill]] %s1829_s1  ;;  %s1625_s28 = smov 0  }
   0x3   :  { %1848 = sst [smem:[#allocation10_spill]] %s1830_s2  ;;  %s1627_s29 = smov 0  }
   0x4   :  { %1849 = sst [smem:[#allocation11_spill]] %s1831_s3 }
   0x5   :  { %1850 = sst [smem:[#allocation12_spill]] %s1835_s7 }
   0x6   :  { %1851 = sst [smem:[#allocation13_spill]] %s1836_s8 }
   0x7   :  { %1852 = sst [smem:[#allocation14_spill]] %s1840_s12 }
   0x8   :  { %1853 = sst [smem:[#allocation15_spill]] %s1841_s13 }
   0x9 LB: > { %1854 = sst [smem:[#allocation2_spill]] %s1516_s25  ;;  %s32_s30 = sadd.s32 1, %s1524_s27  ;;  %s1532_s29 = sphi %s1627_s29, %s23_s29   ;;  %s1528_s28 = sphi %s1625_s28, %s1879_s28   ;;  %s1524_s27 = sphi %s1623_s27, %s1878_s27   ;;  %s1520_s26 = sphi %s1621_s26, %s1877_s26   ;;  %s1516_s25 = sphi %s1619_s25, %s1876_s25  }
   0xa   : > { %1855 = sst [smem:[#allocation3_spill]] %s1524_s27  ;;  %s35_s14 = sadd.s32 1, %s1528_s28 }
   0xb   : > { %1856 = sst [smem:[#allocation4_spill]] %s1528_s28  ;;  %p33_p0 = scmp.ge.s32.totalorder %s32_s30, 2 }
   0xc   : > { %1857 = sst [smem:[#allocation5_spill]] %s1532_s29  ;;  %p1329_p1 = scmp.ge.s32.totalorder %s1532_s29, 1 }
   0xd   : > { %p502_p2 = scmp.lt.s32.totalorder %s1532_s29, 5  ;;  %s1881_s30 = smov (%p33_p0, %s32_s30), 0 }
   0xe   : > { %1858 = sst [smem:[#allocation6_spill]] %s1881_s30  ;;  %s1883_s14 = smov (!%p33_p0, %s35_s14), %s1528_s28 }
   0xf   : > { %p503_p3 = pnand %p1329_p1, %p502_p2  ;;  %p37_p4 = scmp.ge.s32.totalorder %s1883_s14, 2 }
  0x10   : > { %p588_p5 = scmp.lt.s32.totalorder (!%p503_p3), %s1520_s26, 1  ;;  %p592_p6 = scmp.lt.s32.totalorder (!%p503_p3), %s1516_s25, 1 }
  0x11   : > { %s1885_s14 = smov (%p37_p4, %s1883_s14), 0  ;;  %506 = sbr.rel (%p503_p3) target bundleno = 1694 (0x69e), region = 72 }
  0x12   : > { %1859 = sst [smem:[#allocation7_spill]] %s1885_s14 }
  0x13   : > { %s1860_s0 = sld [smem:[#allocation8_spill]] (!%p503_p3) }
  0x14   : > { %s1861_s1 = sld [smem:[#allocation9_spill]] (!%p503_p3) }
  0x15   : > { %s1862_s2 = sld [smem:[#allocation10_spill]] (!%p503_p3) }
  0x16   : > { %s1887_s26 = smov (!%p588_p5, %s1520_s26), 1  ;;  %s1863_s3 = sld [smem:[#allocation11_spill]] }
  0x17   : > { %s1653_s15 = scalar_select %p592_p6, %s1516_s25, 1 }
  0x18   : > { %s1330_s16 = sshll.u32 %s1887_s26, 3  ;;  %s1864_s7 = sld [smem:[#allocation12_spill]] }
  0x19   : > { %s591_s19 = scalar_lea.vmem %s1860_s0, %s1330_s16  ;;  %s1395_s20 = sshll.u32 %s1653_s15, 4 }
  0x1a   : > { %s596_s23 = scalar_lea.vmem %s1861_s1, %s1395_s20  ;;  %s629_s13 = scalar_lea.vmem %s1838_s10, %s1653_s15 }
  0x1b   : > { %s599_s30 = scalar_lea.vmem %s1862_s2, %s1653_s15  ;;  %s632_s1 = scalar_lea.vmem %s1839_s11, %s1653_s15 }
  0x1c   : > { %s1669_s29 = scalar_lea.vmem %s1863_s3, %s1395_s20  ;;  %s1398_s3 = sshll.u32 %s1653_s15, 5 }
  0x1d   : > { %s1700_s0 = scalar_lea.vmem %s1837_s9, %s1398_s3  ;;  %s1866_s22 = sld [smem:[#allocation14_spill]] }
  0x1e   : > { %s1686_s24 = scalar_lea.vmem %s1864_s7, %s1395_s20  ;;  %s1867_s2 = sld [smem:[#allocation15_spill]] }
  0x1f   : > { %s1868_s25 = sld [smem:[#allocation2_spill]] }
  0x23   : > { %s635_s7 = scalar_lea.vmem %s1866_s22, %s1653_s15 }
  0x24   : > { %s1713_s8 = scalar_lea.vmem %s1867_s2, %s1330_s16 }
  0x25   : > { %p1340_p7 = scmp.ne.s32.totalorder %s1868_s25, 0 }
  0x27   : > { %644 = sbr.rel (%p1340_p7) target bundleno = 46 (0x2e), region = 76 }
  0x2c   : > { %v645_v0 = vld [vmem:[%s591_s19] sm:$0xff]  ;;  %vm646_vm0 = vcmask 261120  }
  0x2d   : > { %647 = vst.msk [vmem:[%s1713_s8] sm:$0xff] %vm646_vm0, %v645_v0 }
  0x2e PF: > { %v1400_v1 = vld [vmem:[%s596_s23 + $0x8] sm:$0xff]  ;;  %v1399_v2 = vld [vmem:[%s596_s23] sm:$0xff]  ;;  %vm670_vm1 = vcmask 261120   ;;  %s1534_s2 = smov 104   ;;  %s1535_s3 = smov 120   ;;  %vm693_vm2 = vcmask 64512  }
  0x2f   : > { %680 = vmatpush.bf16.msra.mxu0 %v1400_v1  ;;  %v1464_v5 = vld [vmem:[%s599_s30] ss:$0 sm:$0xff]  ;;  %s1536_s16 = smov 96   ;;  %s1537_s19 = smov 80   ;;  %vm730_vm3 = vcmask 1043456   ;;  %vm928_vm4 = vcmask 130048  }
  0x30   : > { %s1538_s30 = smov 72   ;;  %s1539_s23 = smov 88   ;;  %vm930_vm5 = vcmask 195584   ;;  %vm1087_vm10 = vcmask 523264  }
  0x31   : > { %s1540_s22 = smov 112   ;;  %s1541_s26 = smov 64  }
  0x32   : > { %s1542_s17 = smov 40   ;;  %s1543_s18 = smov 56  }
  0x33   : > { %681 = vmatpush.bf16.msra.mxu0 %v1399_v2  ;;  %s1544_s12 = smov 48   ;;  %s1545_s21 = smov 8  }
  0x34   : > { %v1718_v3 = vld [vmem:[%s1713_s8] sm:$0xff]  ;;  %s1546_s20 = smov 16   ;;  %s1547_s14 = smov 24  }
  0x35   : > { %v649_v4 = vpack.c.bf16 %v1718_v3, %v1718_v3  ;;  %s1869_s25 = scalar_lea.vmem %s1832_s4, %s1653_s15 }
  0x37   : > { %1349 = vmatmul.msk.bf16.vlgmr.msra.gmra.mxu0 %vm670_vm1, %v649_v4 }
  0xb4   : > { %v683_v6 = vpop.f32.mrf.mxu0 }
  0xb5   : > { %v684_v7 = vadd.f32 %v1464_v5, %v683_v6 }
  0xb7   : > { %v687_v8 = vpack.c.bf16 %v684_v7, %v684_v7 }
  0xb9   : > { %v689_v9 = vunpack.c.l.b16 %v687_v8 }
  0xbb   : > { %v1723_v10 = vpack.c.b16 %v689_v9, %v689_v9 }
  0xbc   : > { %v685_v11 = vpop.f32.mrf.mxu0 }
  0xbd   : > { %859 = vrot.lane.b32.xlu2 %v1723_v10, %s1534_s2  ;;  %747 = vrot.lane.b32.xlu1 %v1723_v10, %s1535_s3  ;;  %s1870_s2 = scalar_lea.vmem %s1833_s5, %s1653_s15 }
  0xbe   : > { %691 = vrot.lane.b32.xlu0 %v1723_v10, %s1536_s16 }
  0xc5   : > { %805 = vrot.lane.b32.xlu2 %v1723_v10, %s1537_s19  ;;  %861 = vrot.lane.b32.xlu1 %v1723_v10, %s1538_s30  ;;  %s1871_s19 = scalar_lea.vmem %s1834_s6, %s1653_s15 }
  0xc6   : > { %749 = vrot.lane.b32.xlu0 %v1723_v10, %s1539_s23 }
  0xce   : > { %803 = vrot.lane.b32.xlu0 %v1723_v10, %s1540_s22  ;;  %s1872_s22 = sld [smem:[#allocation13_spill]] }
 0x117   : > { %v860_v12 = vpop.permute.xlu2 %859 }
 0x11f   : > { %v806_v13 = vpop.permute.xlu2 %805 }
 0x120   : > { %v811_v14 = vsel %vm693_vm2, %v806_v13, 0 }
 0x121   : > { %820 = vmatpush.bf16.xpose.msrb.mxu0 %v811_v14 }
 0x12f   : > { %v748_v15 = vpop.permute.xlu1 %747 }
 0x130   : > { %v692_v16 = vpop.permute.xlu0 %691 }
 0x131   : > { %v698_v17 = vsel %vm693_vm2, %v692_v16, 0 }
 0x132   : > { %707 = vmatpush.bf16.xpose.msra.mxu1 %v698_v17 }
 0x137   : > { %v862_v18 = vpop.permute.xlu1 %861 }
 0x138   : > { %v750_v19 = vpop.permute.xlu0 %749  ;;  %v867_v20 = vsel %vm693_vm2, %v862_v18, 0 }
 0x139   : > { %1350 = vmatmul.msk.bf16.vlgmr.msra.gmra.mxu1 %vm693_vm2, %v687_v8  ;;  %v755_v21 = vsel %vm693_vm2, %v750_v19, 0 }
 0x13a   : > { %764 = vmatpush.bf16.xpose.msra.mxu3 %v755_v21 }
 0x140   : > { %v804_v22 = vpop.permute.xlu0 %803 }
 0x141   : > { %1352 = vmatmul.msk.bf16.vlgmr.msra.gmra.mxu3 %vm693_vm2, %v748_v15  ;;  %1354 = vmatmul.msk.bf16.vlgmr.msrb.gmra.mxu0 %vm693_vm2, %v804_v22 }
 0x142   : > { %876 = vmatpush.bf16.xpose.msrb.mxu3 %v867_v20 }
 0x151   : > { %1356 = vmatmul.msk.bf16.vlgmr.msrb.gmra.mxu3 %vm693_vm2, %v860_v12 }
 0x1b6   : > { %v709_v23 = vpop.f32.mrf.mxu1 }
 0x1b7   : > { %v713_v24 = vsel %vm693_vm2, %v709_v23, -inf }
 0x1b8   : > { %714 = vmax.xlane.f32.xlu1 %v713_v24  ;;  %v1402_v24 = vld [vmem:[%s1669_s29 + $0x8] sm:$0xff] }
 0x1b9   : > { %962 = vmatpush.bf16.msra.mxu0 %v1402_v24 }
 0x1be   : > { %v711_v25 = vpop.f32.mrf.mxu1  ;;  %v822_v26 = vpop.f32.mrf.mxu0 }
 0x1bf   : > { %v826_v31 = vsel %vm693_vm2, %v822_v26, -inf  ;;  %v1401_v25 = vld [vmem:[%s1669_s29] sm:$0xff] }
 0x1c0   : > { %963 = vmatpush.bf16.msra.mxu0 %v1401_v25 }
 0x1c4   : > { %v766_v27 = vpop.f32.mrf.mxu3 }
 0x1c5   : > { %v770_v28 = vsel %vm693_vm2, %v766_v27, -inf }
 0x1c6   : > { %771 = vmax.xlane.f32.xlu2 %v770_v28  ;;  %v824_v29 = vpop.f32.mrf.mxu0 }
 0x1cc   : > { %v768_v30 = vpop.f32.mrf.mxu3 }
 0x1ce   : > { %827 = vmax.xlane.f32.xlu2 %v826_v31 }
 0x1d4   : > { %v878_v32 = vpop.f32.mrf.mxu3 }
 0x1d5   : > { %v882_v33 = vsel %vm693_vm2, %v878_v32, -inf }
 0x1d6   : > { %883 = vmax.xlane.f32.xlu0 %v882_v33  ;;  %v1465_v33 = vld [vmem:[%s1869_s25] ss:$0 sm:$0xff] }
 0x1dc   : > { %v880_v34 = vpop.f32.mrf.mxu3 }
 0x1e6   : > { %725 = vrot.lane.b32.xlu2 %v1723_v10, %s1541_s26  ;;  %s1873_s26 = scalar_lea.vmem %s1872_s22, %s1653_s15 }
 0x1ee   : > { %894 = vrot.lane.b32.xlu2 %v1723_v10, %s1542_s17 }
 0x22b   : > { %v715_v35 = vpop.xlane.xlu1 %714 }
 0x22c   : > { %v716_v36 = vsub.f32 %v709_v23, %v715_v35 }
 0x22e   : > { %v717_v37 = vmul.f32 1.442695, %v716_v36 }
 0x230   : > { %1472 = vpow2.f32 %v717_v37 }
 0x236   : > { %v1473_v38 = vpop.eup %1472 }
 0x237   : > { %v719_v39 = vsel %vm693_vm2, %v1473_v38, 0.0 }
 0x238   : > { %720 = vadd.xlane.f32.xlu1 %v719_v39 }
 0x239   : > { %v772_v40 = vpop.xlane.xlu2 %771 }
 0x23a   : > { %v773_v43 = vsub.f32 %v766_v27, %v772_v40  ;;  %v1548_v40 = vmov 32.0  }
 0x23c   : > { %v774_v45 = vmul.f32 1.442695, %v773_v43 }
 0x241   : > { %v828_v41 = vpop.xlane.xlu2 %827 }
 0x242   : > { %v829_v42 = vsub.f32 %v822_v26, %v828_v41 }
 0x244   : > { %v830_v44 = vmul.f32 1.442695, %v829_v42 }
 0x246   : > { %1474 = vpow2.f32 %v830_v44 }
 0x247   : > { %1476 = vpow2.f32 %v774_v45 }
 0x249   : > { %v726_v46 = vpop.permute.xlu2 %725  ;;  %v884_v47 = vpop.xlane.xlu0 %883 }
 0x24a   : > { %v732_v48 = vsel %vm730_vm3, %v726_v46, 0  ;;  %v885_v50 = vsub.f32 %v878_v32, %v884_v47  ;;  %v1404_v47 = vld [vmem:[%s1686_s24 + $0x8] sm:$0xff] }
 0x24b   : > { %741 = vmatpush.bf16.msra.mxu2 %v732_v48 }
 0x24c   : > { %v1475_v49 = vpop.eup %1474  ;;  %v886_v52 = vmul.f32 1.442695, %v885_v50 }
 0x24d   : > { %v832_v51 = vsel %vm693_vm2, %v1475_v49, 0.0  ;;  %v1477_v53 = vpop.eup %1476 }
 0x24e   : > { %833 = vadd.xlane.f32.xlu0 %v832_v51  ;;  %1478 = vpow2.f32 %v886_v52  ;;  %v776_v54 = vsel %vm693_vm2, %v1477_v53, 0.0 }
 0x251   : > { %782 = vrot.lane.b32.xlu1 %v1723_v10, %s1543_s18  ;;  %v895_v62 = vpop.permute.xlu2 %894 }
 0x252   : > { %v900_v1 = vsel %vm730_vm3, %v895_v62, 0 }
 0x254   : > { %v1479_v55 = vpop.eup %1478 }
 0x255   : > { %v888_v56 = vsel %vm693_vm2, %v1479_v55, 0.0 }
 0x256   : > { %777 = vadd.xlane.f32.xlu0 %v776_v54 }
 0x25e   : > { %889 = vadd.xlane.f32.xlu0 %v888_v56  ;;  %v1408_v56 = vld [vmem:[%s1700_s0 + $0x18] sm:$0xff] }
 0x25f   : > { %1095 = vmatpush.bf16.msra.mxu3 %v1408_v56 }
 0x272   : > { %838 = vrot.lane.b32.xlu0 %v1723_v10, %s1544_s12 }
 0x2ab   : > { %v721_v57 = vpop.xlane.xlu1 %720 }
 0x2ac   : > { %1480 = vrcp.f32 %v721_v57 }
 0x2b2   : > { %v1481_v58 = vpop.eup %1480 }
 0x2b3   : > { %v723_v59 = vmul.f32 %v1481_v58, %v1473_v38  ;;  %v1407_v58 = vld [vmem:[%s1700_s0 + $0x10] sm:$0xff] }
 0x2b4   : > { %1096 = vmatpush.bf16.msra.mxu3 %v1407_v58 }
 0x2b5   : > { %v724_v60 = vpack.c.bf16 %v723_v59, %v723_v59  ;;  %v1406_v59 = vld [vmem:[%s1700_s0 + $0x8] sm:$0xff] }
 0x2b7   : > { %1351 = vmatmul.msk.bf16.vlgmr.msra.gmra.mxu2 %vm693_vm2, %v724_v60 }
 0x2b8   : > { %1097 = vmatpush.bf16.msra.mxu3 %v1406_v59 }
 0x2c1   : > { %v834_v61 = vpop.xlane.xlu0 %833 }
 0x2c3   : > { %v783_v63 = vpop.permute.xlu1 %782 }
 0x2c4   : > { %v788_v0 = vsel %vm730_vm3, %v783_v63, 0 }
 0x2c5   : > { %797 = vmatpush.bf16.msrb.mxu2 %v788_v0 }
 0x2c9   : > { %909 = vmatpush.bf16.msra.mxu2 %v900_v1  ;;  %v778_v2 = vpop.xlane.xlu0 %777 }
 0x2ca   : > { %1482 = vrcp.f32 %v778_v2 }
 0x2d0   : > { %v1483_v4 = vpop.eup %1482 }
 0x2d1   : > { %v780_v5 = vmul.f32 %v1483_v4, %v1477_v53  ;;  %v890_v6 = vpop.xlane.xlu0 %889  ;;  %v1466_v4 = vld [vmem:[%s1870_s2] ss:$0 sm:$0xff] }
 0x2d2   : > { %1484 = vrcp.f32 %v890_v6 }
 0x2d3   : > { %v781_v7 = vpack.c.bf16 %v780_v5, %v780_v5  ;;  %1486 = vrcp.f32 %v834_v61 }
 0x2d4   : > { %1488 = vrcp.f32 %v1548_v40  ;;  %v1470_v40 = vld [vmem:[%s632_s1] ss:$0 sm:$0xff] }
 0x2d5   : > { %1353 = vmatmul.msk.bf16.vlgmr.msrb.gmra.mxu2 %vm693_vm2, %v781_v7  ;;  %v1467_v7 = vld [vmem:[%s1871_s19] ss:$0 sm:$0xff] }
 0x2d8   : > { %v1485_v8 = vpop.eup %1484 }
 0x2d9   : > { %v892_v9 = vmul.f32 %v1485_v8, %v1479_v55  ;;  %v1487_v10 = vpop.eup %1486 }
 0x2da   : > { %v836_v11 = vmul.f32 %v1487_v10, %v1475_v49  ;;  %v1489_v41 = vpop.eup %1488  ;;  %v1403_v49 = vld [vmem:[%s1686_s24] sm:$0xff] }
 0x2db   : > { %v893_v12 = vpack.c.bf16 %v892_v9, %v892_v9  ;;  %v975_v42 = vmul.f32 32.0, %v1489_v41  ;;  %vm979_vm6 = vweird.f32 %v1489_v41 }
 0x2dc   : > { %v837_v15 = vpack.c.bf16 %v836_v11, %v836_v11 }
 0x2dd   : > { %v976_v43 = vsub.f32 1.0, %v975_v42  ;;  %v1471_v42 = vld [vmem:[%s635_s7] ss:$0 sm:$0xff] }
 0x2df   : > { %v977_v44 = vmul.f32 %v1489_v41, %v976_v43 }
 0x2e1   : > { %v978_v45 = vadd.f32 %v1489_v41, %v977_v44 }
 0x2e3   : > { %v980_v46 = vsel %vm979_vm6, %v1489_v41, %v978_v45 }
 0x2e4   : > { %v839_v13 = vpop.permute.xlu0 %838 }
 0x2e5   : > { %1357 = vmatmul.msk.bf16.vlgmr.msra.gmra.mxu2 %vm693_vm2, %v893_v12  ;;  %v844_v14 = vsel %vm730_vm3, %v839_v13, 0  ;;  %v1405_v12 = vld [vmem:[%s1700_s0] sm:$0xff] }
 0x2e6   : > { %853 = vmatpush.bf16.msrb.mxu1 %v844_v14  ;;  %1098 = vmatpush.bf16.msra.mxu3 %v1405_v12  ;;  %v1468_v13 = vld [vmem:[%s1873_s26] ss:$0 sm:$0xff] }
 0x2e9   : > { %1355 = vmatmul.msk.bf16.vlgmr.msrb.gmra.mxu1 %vm693_vm2, %v837_v15 }
 0x2ea   : > { %1042 = vmatpush.bf16.msra.mxu1 %v1404_v47 }
 0x2ee   : > { %1043 = vmatpush.bf16.msra.mxu1 %v1403_v49 }
 0x33a   : > { %v743_v16 = vpop.f32.mrf.mxu2 }
 0x342   : > { %v745_v17 = vpop.f32.mrf.mxu2 }
 0x358   : > { %v799_v18 = vpop.f32.mrf.mxu2 }
 0x359   : > { %916 = vrot.lane.b32.xlu1 %v799_v18, %s1545_s21 }
 0x360   : > { %v801_v19 = vpop.f32.mrf.mxu2 }
 0x366   : > { %v855_v20 = vpop.f32.mrf.mxu1 }
 0x367   : > { %920 = vrot.lane.b32.xlu2 %v855_v20, %s1546_s20 }
 0x368   : > { %v911_v21 = vpop.f32.mrf.mxu2 }
 0x369   : > { %924 = vrot.lane.b32.xlu1 %v911_v21, %s1547_s14 }
 0x36e   : > { %v857_v22 = vpop.f32.mrf.mxu1 }
 0x370   : > { %v913_v23 = vpop.f32.mrf.mxu2 }
 0x3c1   : > { %v921_v28 = vpop.permute.xlu2 %920 }
 0x3cb   : > { %v917_v26 = vpop.permute.xlu1 %916 }
 0x3cc   : > { %v927_v27 = vsel %vm693_vm2, %v743_v16, %v917_v26 }
 0x3cd   : > { %v929_v30 = vsel %vm928_vm4, %v927_v27, %v921_v28 }
 0x3db   : > { %v925_v29 = vpop.permute.xlu1 %924 }
 0x3dc   : > { %v931_v31 = vsel %vm930_vm5, %v929_v30, %v925_v29 }
 0x3dd   : > { %v932_v32 = vpack.c.bf16 %v931_v31, %v931_v31 }
 0x3df   : > { %1366 = vmatmul.msk.bf16.vlgmr.msra.gmra.mxu0 %vm670_vm1, %v932_v32 }
 0x45c   : > { %v965_v34 = vpop.f32.mrf.mxu0 }
 0x45d   : > { %v966_v35 = vadd.f32 %v1465_v33, %v965_v34 }
 0x45f   : > { %v971_v36 = vsel %vm670_vm1, %v966_v35, 0.0  ;;  %v982_v37 = vmul.f32 %v966_v35, %v966_v35 }
 0x460   : > { %972 = vadd.xlane.f32.xlu2 %v971_v36 }
 0x461   : > { %v983_v38 = vsel %vm670_vm1, %v982_v37, 0.0 }
 0x462   : > { %984 = vadd.xlane.f32.xlu1 %v983_v38 }
 0x464   : > { %v967_v39 = vpop.f32.mrf.mxu0 }
 0x4d3   : > { %v973_v48 = vpop.xlane.xlu2 %972 }
 0x4d4   : > { %v981_v50 = vmul.f32 %v980_v46, %v973_v48 }
 0x4d5   : > { %v985_v51 = vpop.xlane.xlu1 %984 }
 0x4d6   : > { %v987_v52 = vmul.f32 %v981_v50, %v981_v50  ;;  %v986_v53 = vmul.f32 %v985_v51, %v980_v46  ;;  %v990_v2 = vsub.f32 %v966_v35, %v981_v50 }
 0x4d8   : > { %v988_v54 = vsub.f32 %v986_v53, %v987_v52 }
 0x4da   : > { %v989_v55 = vmax.f32 %v988_v54, 0.0 }
 0x4dc   : > { %v991_v57 = vadd.f32 1e-05, %v989_v55 }
 0x4de   : > { %1490 = vrsqrt.f32 %v991_v57  ;;  %vm998_vm8 = vweird.f32 %v991_v57 }
 0x4e4   : > { %v1491_v60 = vpop.eup %1490 }
 0x4e5   : > { %v993_v61 = vmul.f32 %v1491_v60, %v991_v57  ;;  %vm999_vm7 = vweird.f32 %v1491_v60 }
 0x4e6   : > { %vm1000_vm9 = vmor %vm998_vm8, %vm999_vm7 }
 0x4e7   : > { %v994_v62 = vmul.f32 %v1491_v60, %v993_v61 }
 0x4e9   : > { %v995_v63 = vmul.f32 0.5, %v994_v62 }
 0x4eb   : > { %v996_v0 = vsub.f32 1.5, %v995_v63 }
 0x4ed   : > { %v997_v1 = vmul.f32 %v1491_v60, %v996_v0 }
 0x4ef   : > { %v1001_v5 = vsel %vm1000_vm9, %v1491_v60, %v997_v1 }
 0x4f0   : > { %v1002_v6 = vmul.f32 %v1001_v5, %v990_v2 }
 0x4f2   : > { %v1006_v8 = vmul.f32 %v1466_v4, %v1002_v6 }
 0x4f4   : > { %v1010_v9 = vadd.f32 %v1467_v7, %v1006_v8 }
 0x4f6   : > { %v1011_v10 = vadd.f32 %v1010_v9, %v1718_v3  ;;  %v1469_v3 = vld [vmem:[%s629_s13] ss:$0 sm:$0xff] }
 0x4f8   : > { %v1012_v11 = vpack.c.bf16 %v1011_v10, %v1011_v10 }
 0x4fa   : > { %1375 = vmatmul.msk.bf16.vlgmr.msra.gmra.mxu1 %vm670_vm1, %v1012_v11 }
 0x577   : > { %v1045_v14 = vpop.f32.mrf.mxu1 }
 0x578   : > { %v1046_v15 = vadd.f32 %v1468_v13, %v1045_v14 }
 0x57a   : > { %v1049_v16 = vmax.f32 %v1046_v15, 0.0 }
 0x57c   : > { %v1050_v17 = vpack.c.bf16 %v1049_v16, %v1049_v16 }
 0x57e   : > { %1392 = vmatmul.msk.bf16.vlgmr.msra.gmra.mxu3 %vm1087_vm10, %v1050_v17 }
 0x57f   : > { %v1047_v18 = vpop.f32.mrf.mxu1 }
 0x601   : > { %v1100_v19 = vpop.f32.mrf.mxu3 }
 0x602   : > { %v1101_v20 = vadd.f32 %v1469_v3, %v1100_v19 }
 0x604   : > { %v1106_v21 = vsel %vm670_vm1, %v1101_v20, 0.0  ;;  %v1110_v22 = vmul.f32 %v1101_v20, %v1101_v20 }
 0x605   : > { %1107 = vadd.xlane.f32.xlu0 %v1106_v21 }
 0x606   : > { %v1111_v23 = vsel %vm670_vm1, %v1110_v22, 0.0 }
 0x607   : > { %1112 = vadd.xlane.f32.xlu2 %v1111_v23 }
 0x609   : > { %v1102_v24 = vpop.f32.mrf.mxu3 }
 0x678   : > { %v1108_v25 = vpop.xlane.xlu0 %1107 }
 0x679   : > { %v1109_v26 = vmul.f32 %v1108_v25, %v980_v46 }
 0x67a   : > { %v1113_v27 = vpop.xlane.xlu2 %1112 }
 0x67b   : > { %v1115_v28 = vmul.f32 %v1109_v26, %v1109_v26  ;;  %v1114_v29 = vmul.f32 %v1113_v27, %v980_v46  ;;  %v1118_v39 = vsub.f32 %v1101_v20, %v1109_v26 }
 0x67d   : > { %v1116_v30 = vsub.f32 %v1114_v29, %v1115_v28 }
 0x67f   : > { %v1117_v31 = vmax.f32 %v1116_v30, 0.0 }
 0x681   : > { %v1119_v32 = vadd.f32 1e-05, %v1117_v31 }
 0x683   : > { %1492 = vrsqrt.f32 %v1119_v32  ;;  %vm1126_vm12 = vweird.f32 %v1119_v32 }
 0x689   : > { %v1493_v33 = vpop.eup %1492 }
 0x68a   : > { %v1121_v34 = vmul.f32 %v1493_v33, %v1119_v32  ;;  %vm1127_vm11 = vweird.f32 %v1493_v33 }
 0x68b   : > { %vm1128_vm13 = vmor %vm1126_vm12, %vm1127_vm11 }
 0x68c   : > { %v1122_v35 = vmul.f32 %v1493_v33, %v1121_v34 }
 0x68e   : > { %v1123_v36 = vmul.f32 0.5, %v1122_v35 }
 0x690   : > { %v1124_v37 = vsub.f32 1.5, %v1123_v36 }
 0x692   : > { %v1125_v38 = vmul.f32 %v1493_v33, %v1124_v37 }
 0x694   : > { %v1129_v41 = vsel %vm1128_vm13, %v1493_v33, %v1125_v38 }
 0x695   : > { %v1130_v43 = vmul.f32 %v1129_v41, %v1118_v39 }
 0x697   : > { %v1134_v44 = vmul.f32 %v1470_v40, %v1130_v43 }
 0x699   : > { %v1138_v45 = vadd.f32 %v1471_v42, %v1134_v44 }
 0x69b   : > { %v1139_v46 = vadd.f32 %v1138_v45, %v1011_v10 }
 0x69d   : > { %1140 = vst.msk [vmem:[%s1713_s8] sm:$0xff] %vm670_vm1, %v1139_v46 }
 0x69e PF: > { %s1875_s14 = sld [smem:[#allocation5_spill]] }
 0x69f   : > { %s1876_s25 = sld [smem:[#allocation3_spill]] }
 0x6a0   : > { %s1877_s26 = sld [smem:[#allocation4_spill]] }
 0x6a1   : > { %s1878_s27 = sld [smem:[#allocation6_spill]] }
 0x6a2   : > { %s1879_s28 = sld [smem:[#allocation7_spill]] }
 0x6a4   : > { %s23_s29 = sadd.s32 1, %s1875_s14  }
 0x6a5   : > { %p20_p8 = scmp.ge.s32.totalorder %s23_s29, 6  }
 0x6a7   :  { %22 = sbr.rel (!%p20_p8) target bundleno = 9 (0x9), region = 142 }

</bundles_post_ra>
